<compile_context>
chip_gen: v5e
topology: v5e:2x2
jax: 0.10.0
libtpu: 0.0.40
codegen_flags: <defaults>
</compile_context>

<pallas_src>
import jax
import jax.numpy as jnp
from jax.experimental import pallas as pl
from jax.experimental.pallas import tpu as pltpu


GATE_PAD = 128  # lane-dense width for the gate output


def _round_up(x, m):
    return ((x + m - 1) // m) * m


def _bridge_kernel(
    sci_ref, cul_ref,
    w_sci_ref, b_sci_ref,
    w_cul_ref, b_cul_ref,
    w_a1_sci_ref, w_a1_cul_ref, b_a1_ref,
    ln_g_ref, ln_b_ref,
    w_a2_ref, b_a2_ref,
    w_gate_sci_ref, w_gate_cul_ref, b_gate_ref,
    out_ref, gate_ref,
):
    f32 = jnp.float32
    cdt = w_sci_ref.dtype  # weight storage / MXU compute dtype

    # Cast inputs to the weight dtype so bf16 weights keep the MXU on the
    # fast bf16 path (f32 accumulation via preferred_element_type below).
    sci = sci_ref[...].astype(cdt)
    cul = cul_ref[...].astype(cdt)

    # --- Scientific encoder + its gate-logit partial sum -------------------
    sci_enc = (jnp.dot(sci, w_sci_ref[...], preferred_element_type=f32)
               + b_sci_ref[...].astype(f32))
    g_sci = jnp.sum(sci_enc * w_gate_sci_ref[...].astype(f32),
                    axis=-1, keepdims=True)

    # --- Cultural encoder + its gate-logit partial sum ---------------------
    cul_enc = (jnp.dot(cul, w_cul_ref[...], preferred_element_type=f32)
               + b_cul_ref[...].astype(f32))
    g_cul = jnp.sum(cul_enc * w_gate_cul_ref[...].astype(f32),
                    axis=-1, keepdims=True)

    # Integration gate: Linear(2H -> 1) + Sigmoid, as two lane reduces over
    # the split weight halves (no N=1 matmul, no concat).  exp on the EUP.
    gate_logit = g_sci + g_cul + b_gate_ref[...].astype(f32)
    gate = pl.reciprocal(1.0 + jnp.exp(-gate_logit), approx=False)  # (TB, 1) f32

    # Alignment network: Linear(2H->H) (split halves) -> LayerNorm -> ReLU
    # -> Linear(H->H).  All matmuls in the weight dtype, f32 accumulation.
    h = (jnp.dot(sci_enc.astype(cdt), w_a1_sci_ref[...], preferred_element_type=f32)
         + jnp.dot(cul_enc.astype(cdt), w_a1_cul_ref[...], preferred_element_type=f32)
         + b_a1_ref[...].astype(f32))
    mu = jnp.mean(h, axis=-1, keepdims=True)
    xc = h - mu
    var = jnp.mean(xc * xc, axis=-1, keepdims=True)
    h_ln = (xc * jax.lax.rsqrt(var + 1e-5) * ln_g_ref[...].astype(f32)
            + ln_b_ref[...].astype(f32))
    h_relu = jnp.maximum(h_ln, 0.0)
    align = (jnp.dot(h_relu.astype(w_a2_ref.dtype), w_a2_ref[...],
                     preferred_element_type=f32)
             + b_a2_ref[...].astype(f32))

    # integrated = gate*align + (1-gate)*sci_enc  ==  sci_enc + gate*(align-sci_enc)
    integrated = sci_enc + gate * (align - sci_enc)

    out_ref[...] = integrated.astype(out_ref.dtype)
    # Lane-dense gate store; the wrapper slices back to (B, 1).
    gate_ref[...] = jnp.broadcast_to(gate, gate_ref.shape).astype(gate_ref.dtype)


def cultural_science_bridge(sci, cul, params, *, batch_tile=None):
    """sci, cul: (B, H). Returns (integrated (B, H), gate (B, 1))."""
    B, H = sci.shape
    out_dtype = sci.dtype

    # ---- Batch tile selection ---------------------------------------------
    # Tiny batches: one tile (block must equal the full dim or be 8-aligned).
    # Otherwise: at least 2 grid steps so dimension_semantics=("parallel",)
    # can shard across v7x's two TensorCores; cap at 256 rows so the
    # resident-weight plan fits v7x's 64 MiB VMEM.  (On v6e's 128 MiB a
    # larger batch_tile — e.g. 512 — can be passed explicitly.)
    if batch_tile is not None:
        tb = int(batch_tile)
    elif B <= 8:
        tb = B
    else:
        tb = min(256, _round_up(pl.cdiv(B, 2), 8))
    grid = (pl.cdiv(B, tb),)

    act_spec = pl.BlockSpec((tb, H), lambda i: (i, 0))

    # Weights / biases: constant block index -> DMA'd once, VMEM-resident
    # across all batch tiles, and single-buffered (double-buffering a
    # constant block is wasted VMEM).  At large H, cast these to bf16 in the
    # wrapper so the five HxH matrices fit v7x's 64 MiB budget.
    weight_inputs = (
        params["w_sci"], params["b_sci"],
        params["w_cul"], params["b_cul"],
        params["w_a1_sci"], params["w_a1_cul"], params["b_a1"],
        params["ln_g"], params["ln_b"],
        params["w_a2"], params["b_a2"],
        params["w_gate_sci"], params["w_gate_cul"], params["b_gate"],
    )
    weight_specs = [
        pl.BlockSpec(x.shape, lambda i: (0, 0), pipeline_mode=pl.Buffered(1))
        for x in weight_inputs
    ]

    in_specs = [act_spec, act_spec] + weight_specs
    out_specs = (
        pl.BlockSpec((tb, H), lambda i: (i, 0)),
        pl.BlockSpec((tb, GATE_PAD), lambda i: (i, 0)),
    )
    out_shape = (
        jax.ShapeDtypeStruct((B, H), out_dtype),
        jax.ShapeDtypeStruct((B, GATE_PAD), out_dtype),
    )

    # ---- VMEM budget / compiler params -------------------------------------
    in_isz = jnp.dtype(sci.dtype).itemsize
    out_isz = jnp.dtype(out_dtype).itemsize
    weight_bytes = sum(int(x.size) * jnp.dtype(x.dtype).itemsize
                       for x in weight_inputs)            # single-buffered
    act_bytes = 2 * 2 * tb * H * in_isz                   # sci+cul, double-buffered
    out_bytes = 2 * (tb * H + tb * GATE_PAD) * out_isz    # outputs, double-buffered
    interm_bytes = 8 * tb * H * 4                         # live f32 temporaries
    needed = weight_bytes + act_bytes + out_bytes + interm_bytes + (4 << 20)
    try:
        vmem_cap = int(pltpu.get_tpu_info().vmem_capacity_bytes)
    except Exception:
        vmem_cap = 64 << 20  # conservative (v7x per-TC capacity)
    vmem_limit = int(max(16 << 20, min(needed, vmem_cap - (2 << 20))))

    cost = pl.CostEstimate(
        flops=int(10 * B * H * H),            # 5 HxH matmuls, 2 flops/MAC
        transcendentals=int(2 * B),           # exp + rsqrt per row
        bytes_accessed=int(weight_bytes + 2 * B * H * in_isz
                           + (B * H + B * GATE_PAD) * out_isz),
    )

    integrated, gate_padded = pl.pallas_call(
        _bridge_kernel,
        grid=grid,
        in_specs=in_specs,
        out_specs=out_specs,
        out_shape=out_shape,
        compiler_params=pltpu.CompilerParams(
            dimension_semantics=("parallel",),
            vmem_limit_bytes=vmem_limit,
        ),
        cost_estimate=cost,
    )(sci, cul, *weight_inputs)

    return integrated, gate_padded[:, :1]


def init_params(key, hidden_dim, dtype=jnp.float32):
    f32 = jnp.float32
    H = hidden_dim
    ks = jax.random.split(key, 6)
    s = 0.02

    def lin(k, fan_in, fan_out):
        kw, kb = jax.random.split(k)
        w = jax.random.normal(kw, (fan_in, fan_out), f32) * s
        b = jax.random.normal(kb, (1, fan_out), f32) * s
        return w, b

    w_sci, b_sci = lin(ks[0], H, H)
    w_cul, b_cul = lin(ks[1], H, H)
    w_a1, b_a1 = lin(ks[2], 2 * H, H)
    w_a2, b_a2 = lin(ks[3], H, H)
    w_gate = jax.random.normal(ks[4], (1, 2 * H), f32) * s
    b_gate = jax.random.normal(ks[5], (1, 1), f32) * s

    p = dict(
        w_sci=w_sci, b_sci=b_sci,
        w_cul=w_cul, b_cul=b_cul,
        # Split the (2H, H) alignment weight / (1, 2H) gate weight so the
        # kernel never materializes the (B, 2H) concat.
        w_a1_sci=w_a1[:H], w_a1_cul=w_a1[H:], b_a1=b_a1,
        ln_g=jnp.ones((1, H), f32), ln_b=jnp.zeros((1, H), f32),
        w_a2=w_a2, b_a2=b_a2,
        w_gate_sci=w_gate[:, :H], w_gate_cul=w_gate[:, H:], b_gate=b_gate,
    )
    return jax.tree_util.tree_map(lambda a: a.astype(dtype), p)


def reference(sci, cul, p):
    """Pure-JAX reference in f32, matching the PyTorch module semantics."""
    f32 = jnp.float32
    p = jax.tree_util.tree_map(lambda a: a.astype(f32), p)
    sci, cul = sci.astype(f32), cul.astype(f32)

    sci_enc = sci @ p["w_sci"] + p["b_sci"]
    cul_enc = cul @ p["w_cul"] + p["b_cul"]
    combined = jnp.concatenate([sci_enc, cul_enc], axis=1)

    w_gate = jnp.concatenate([p["w_gate_sci"], p["w_gate_cul"]], axis=1)
    gate = jax.nn.sigmoid(
        jnp.sum(combined * w_gate, axis=-1, keepdims=True) + p["b_gate"])

    w_a1 = jnp.concatenate([p["w_a1_sci"], p["w_a1_cul"]], axis=0)
    h = combined @ w_a1 + p["b_a1"]
    mu = jnp.mean(h, axis=-1, keepdims=True)
    var = jnp.mean((h - mu) ** 2, axis=-1, keepdims=True)
    h = (h - mu) * jax.lax.rsqrt(var + 1e-5) * p["ln_g"] + p["ln_b"]
    h = jax.nn.relu(h)
    align = h @ p["w_a2"] + p["b_a2"]
    return gate * align + (1.0 - gate) * sci_enc, gate


if __name__ == "__main__":
    B, H = 8, 32
    key = jax.random.PRNGKey(0)
    k_sci, k_cul, k_par = jax.random.split(key, 3)

    sci = jax.random.normal(k_sci, (B, H), jnp.float32)
    cul = jax.random.normal(k_cul, (B, H), jnp.float32)

    # --- f32 path: tight correctness check against the reference ---
    params_f32 = init_params(k_par, H, jnp.float32)
    integrated, gate = cultural_science_bridge(sci, cul, params_f32)
    integrated = jax.block_until_ready(integrated)
    gate = jax.block_until_ready(gate)

    ref_int, ref_gate = reference(sci, cul, params_f32)
    assert integrated.shape == (B, H) and gate.shape == (B, 1)
    assert jnp.allclose(integrated, ref_int, atol=1e-5, rtol=1e-5)
    assert jnp.allclose(gate, ref_gate, atol=1e-5, rtol=1e-5)

    # --- bf16 path (perf-oriented storage dtype): looser tolerance ---
    params_bf16 = jax.tree_util.tree_map(
        lambda a: a.astype(jnp.bfloat16), params_f32)
    sci_b = sci.astype(jnp.bfloat16)
    cul_b = cul.astype(jnp.bfloat16)
    int_b, gate_b = cultural_science_bridge(sci_b, cul_b, params_bf16)
    int_b = jax.block_until_ready(int_b)
    gate_b = jax.block_until_ready(gate_b)

    ref_int_b, ref_gate_b = reference(sci_b, cul_b, params_bf16)
    assert int_b.shape == (B, H) and gate_b.shape == (B, 1)
    assert jnp.allclose(int_b.astype(jnp.float32), ref_int_b, atol=5e-2, rtol=5e-2)
    assert jnp.allclose(gate_b.astype(jnp.float32), ref_gate_b, atol=5e-2, rtol=5e-2)

    # --- multi-tile batch path (grid > 1, ragged last tile) ---
    B2 = 40
    sci2 = jax.random.normal(jax.random.PRNGKey(1), (B2, H), jnp.float32)
    cul2 = jax.random.normal(jax.random.PRNGKey(2), (B2, H), jnp.float32)
    int2, gate2 = cultural_science_bridge(sci2, cul2, params_f32)
    int2 = jax.block_until_ready(int2)
    ref_int2, ref_gate2 = reference(sci2, cul2, params_f32)
    assert jnp.allclose(int2, ref_int2, atol=1e-5, rtol=1e-5)
    assert jnp.allclose(gate2, ref_gate2, atol=1e-5, rtol=1e-5)

    print("KERNEL_OK")
</pallas_src>

<mosaic_0001>
module attributes {stable_mosaic.version = 11 : i64} {
  func.func @_bridge_kernel(%arg0: i32, %arg1: memref<8x32xf32, #tpu.memory_space<vmem>>, %arg2: memref<8x32xf32, #tpu.memory_space<vmem>>, %arg3: memref<32x32xf32, #tpu.memory_space<vmem>>, %arg4: memref<1x32xf32, #tpu.memory_space<vmem>>, %arg5: memref<32x32xf32, #tpu.memory_space<vmem>>, %arg6: memref<1x32xf32, #tpu.memory_space<vmem>>, %arg7: memref<32x32xf32, #tpu.memory_space<vmem>>, %arg8: memref<32x32xf32, #tpu.memory_space<vmem>>, %arg9: memref<1x32xf32, #tpu.memory_space<vmem>>, %arg10: memref<1x32xf32, #tpu.memory_space<vmem>>, %arg11: memref<1x32xf32, #tpu.memory_space<vmem>>, %arg12: memref<32x32xf32, #tpu.memory_space<vmem>>, %arg13: memref<1x32xf32, #tpu.memory_space<vmem>>, %arg14: memref<1x32xf32, #tpu.memory_space<vmem>>, %arg15: memref<1x32xf32, #tpu.memory_space<vmem>>, %arg16: memref<1x1xf32, #tpu.memory_space<vmem>>, %arg17: memref<8x32xf32, #tpu.memory_space<vmem>>, %arg18: memref<8x128xf32, #tpu.memory_space<vmem>>) attributes {dimension_semantics = [#tpu.dimension_semantics<parallel>], iteration_bounds = array<i64: 1>, scalar_prefetch = 0 : i64, scratch_operands = 0 : i64, tpu.core_type = #tpu.core_type<tc>, window_params = [{transform_indices = @transform_0, window_bounds = array<i64: 8, 32>}, {transform_indices = @transform_1, window_bounds = array<i64: 8, 32>}, {pipeline_mode = #tpu.pipeline_mode<synchronous>, transform_indices = @transform_2, window_bounds = array<i64: 32, 32>}, {pipeline_mode = #tpu.pipeline_mode<synchronous>, transform_indices = @transform_3, window_bounds = array<i64: 1, 32>}, {pipeline_mode = #tpu.pipeline_mode<synchronous>, transform_indices = @transform_4, window_bounds = array<i64: 32, 32>}, {pipeline_mode = #tpu.pipeline_mode<synchronous>, transform_indices = @transform_5, window_bounds = array<i64: 1, 32>}, {pipeline_mode = #tpu.pipeline_mode<synchronous>, transform_indices = @transform_6, window_bounds = array<i64: 32, 32>}, {pipeline_mode = #tpu.pipeline_mode<synchronous>, transform_indices = @transform_7, window_bounds = array<i64: 32, 32>}, {pipeline_mode = #tpu.pipeline_mode<synchronous>, transform_indices = @transform_8, window_bounds = array<i64: 1, 32>}, {pipeline_mode = #tpu.pipeline_mode<synchronous>, transform_indices = @transform_9, window_bounds = array<i64: 1, 32>}, {pipeline_mode = #tpu.pipeline_mode<synchronous>, transform_indices = @transform_10, window_bounds = array<i64: 1, 32>}, {pipeline_mode = #tpu.pipeline_mode<synchronous>, transform_indices = @transform_11, window_bounds = array<i64: 32, 32>}, {pipeline_mode = #tpu.pipeline_mode<synchronous>, transform_indices = @transform_12, window_bounds = array<i64: 1, 32>}, {pipeline_mode = #tpu.pipeline_mode<synchronous>, transform_indices = @transform_13, window_bounds = array<i64: 1, 32>}, {pipeline_mode = #tpu.pipeline_mode<synchronous>, transform_indices = @transform_14, window_bounds = array<i64: 1, 32>}, {pipeline_mode = #tpu.pipeline_mode<synchronous>, transform_indices = @transform_15, window_bounds = array<i64: 1, 1>}, {transform_indices = @transform_16, window_bounds = array<i64: 8, 32>}, {transform_indices = @transform_17, window_bounds = array<i64: 8, 128>}]} {
    %c0 = arith.constant 0 : index
    %c0_0 = arith.constant 0 : index
    %0 = vector.load %arg1[%c0, %c0_0] : memref<8x32xf32, #tpu.memory_space<vmem>>, vector<8x32xf32>
    %c0_1 = arith.constant 0 : index
    %c0_2 = arith.constant 0 : index
    %1 = vector.load %arg2[%c0_1, %c0_2] : memref<8x32xf32, #tpu.memory_space<vmem>>, vector<8x32xf32>
    %c0_3 = arith.constant 0 : index
    %c0_4 = arith.constant 0 : index
    %2 = vector.load %arg3[%c0_3, %c0_4] : memref<32x32xf32, #tpu.memory_space<vmem>>, vector<32x32xf32>
    %cst = arith.constant dense<0.000000e+00> : vector<8x32xf32>
    %3 = tpu.matmul %0, %2, %cst {dimension_numbers = #tpu.dot_dimension_numbers<[1], [0], [0], [1], [0, 0, 1, 1], [], []>} : vector<8x32xf32>, vector<32x32xf32>, vector<8x32xf32> -> vector<8x32xf32>
    %c0_5 = arith.constant 0 : index
    %c0_6 = arith.constant 0 : index
    %4 = vector.load %arg4[%c0_5, %c0_6] : memref<1x32xf32, #tpu.memory_space<vmem>>, vector<1x32xf32>
    %5 = vector.broadcast %4 : vector<1x32xf32> to vector<8x32xf32>
    %6 = arith.addf %3, %5 : vector<8x32xf32>
    %c0_7 = arith.constant 0 : index
    %c0_8 = arith.constant 0 : index
    %7 = vector.load %arg14[%c0_7, %c0_8] : memref<1x32xf32, #tpu.memory_space<vmem>>, vector<1x32xf32>
    %8 = vector.broadcast %7 : vector<1x32xf32> to vector<8x32xf32>
    %9 = arith.mulf %6, %8 : vector<8x32xf32>
    %cst_9 = arith.constant dense<0.000000e+00> : vector<8xf32>
    %10 = vector.multi_reduction <add>, %9, %cst_9 [1] : vector<8x32xf32> to vector<8xf32>
    %11 = vector.shape_cast %10 : vector<8xf32> to vector<8x1xf32>
    %c0_10 = arith.constant 0 : index
    %c0_11 = arith.constant 0 : index
    %12 = vector.load %arg5[%c0_10, %c0_11] : memref<32x32xf32, #tpu.memory_space<vmem>>, vector<32x32xf32>
    %cst_12 = arith.constant dense<0.000000e+00> : vector<8x32xf32>
    %13 = tpu.matmul %1, %12, %cst_12 {dimension_numbers = #tpu.dot_dimension_numbers<[1], [0], [0], [1], [0, 0, 1, 1], [], []>} : vector<8x32xf32>, vector<32x32xf32>, vector<8x32xf32> -> vector<8x32xf32>
    %c0_13 = arith.constant 0 : index
    %c0_14 = arith.constant 0 : index
    %14 = vector.load %arg6[%c0_13, %c0_14] : memref<1x32xf32, #tpu.memory_space<vmem>>, vector<1x32xf32>
    %15 = vector.broadcast %14 : vector<1x32xf32> to vector<8x32xf32>
    %16 = arith.addf %13, %15 : vector<8x32xf32>
    %c0_15 = arith.constant 0 : index
    %c0_16 = arith.constant 0 : index
    %17 = vector.load %arg15[%c0_15, %c0_16] : memref<1x32xf32, #tpu.memory_space<vmem>>, vector<1x32xf32>
    %18 = vector.broadcast %17 : vector<1x32xf32> to vector<8x32xf32>
    %19 = arith.mulf %16, %18 : vector<8x32xf32>
    %cst_17 = arith.constant dense<0.000000e+00> : vector<8xf32>
    %20 = vector.multi_reduction <add>, %19, %cst_17 [1] : vector<8x32xf32> to vector<8xf32>
    %21 = vector.shape_cast %20 : vector<8xf32> to vector<8x1xf32>
    %22 = arith.addf %11, %21 : vector<8x1xf32>
    %c0_18 = arith.constant 0 : index
    %c0_19 = arith.constant 0 : index
    %23 = vector.load %arg16[%c0_18, %c0_19] : memref<1x1xf32, #tpu.memory_space<vmem>>, vector<1x1xf32>
    %24 = vector.broadcast %23 : vector<1x1xf32> to vector<8x1xf32>
    %25 = arith.addf %22, %24 : vector<8x1xf32>
    %cst_20 = arith.constant 0.000000e+00 : f32
    %26 = vector.broadcast %cst_20 : f32 to vector<8x1xf32>
    %27 = arith.subf %26, %25 : vector<8x1xf32>
    %28 = math.exp %27 : vector<8x1xf32>
    %cst_21 = arith.constant 1.000000e+00 : f32
    %29 = vector.broadcast %cst_21 : f32 to vector<8x1xf32>
    %30 = arith.addf %29, %28 : vector<8x1xf32>
    %31 = tpu.reciprocal %30 : vector<8x1xf32> -> vector<8x1xf32>
    %c0_22 = arith.constant 0 : index
    %c0_23 = arith.constant 0 : index
    %32 = vector.load %arg7[%c0_22, %c0_23] : memref<32x32xf32, #tpu.memory_space<vmem>>, vector<32x32xf32>
    %cst_24 = arith.constant dense<0.000000e+00> : vector<8x32xf32>
    %33 = tpu.matmul %6, %32, %cst_24 {dimension_numbers = #tpu.dot_dimension_numbers<[1], [0], [0], [1], [0, 0, 1, 1], [], []>} : vector<8x32xf32>, vector<32x32xf32>, vector<8x32xf32> -> vector<8x32xf32>
    %c0_25 = arith.constant 0 : index
    %c0_26 = arith.constant 0 : index
    %34 = vector.load %arg8[%c0_25, %c0_26] : memref<32x32xf32, #tpu.memory_space<vmem>>, vector<32x32xf32>
    %cst_27 = arith.constant dense<0.000000e+00> : vector<8x32xf32>
    %35 = tpu.matmul %16, %34, %cst_27 {dimension_numbers = #tpu.dot_dimension_numbers<[1], [0], [0], [1], [0, 0, 1, 1], [], []>} : vector<8x32xf32>, vector<32x32xf32>, vector<8x32xf32> -> vector<8x32xf32>
    %36 = arith.addf %33, %35 : vector<8x32xf32>
    %c0_28 = arith.constant 0 : index
    %c0_29 = arith.constant 0 : index
    %37 = vector.load %arg9[%c0_28, %c0_29] : memref<1x32xf32, #tpu.memory_space<vmem>>, vector<1x32xf32>
    %38 = vector.broadcast %37 : vector<1x32xf32> to vector<8x32xf32>
    %39 = arith.addf %36, %38 : vector<8x32xf32>
    %cst_30 = arith.constant dense<0.000000e+00> : vector<8xf32>
    %40 = vector.multi_reduction <add>, %39, %cst_30 [1] : vector<8x32xf32> to vector<8xf32>
    %41 = vector.shape_cast %40 : vector<8xf32> to vector<8x1xf32>
    %cst_31 = arith.constant 3.200000e+01 : f32
    %42 = vector.broadcast %cst_31 : f32 to vector<8x1xf32>
    %43 = arith.divf %41, %42 : vector<8x1xf32>
    %44 = vector.broadcast %43 : vector<8x1xf32> to vector<8x32xf32>
    %45 = arith.subf %39, %44 : vector<8x32xf32>
    %46 = arith.mulf %45, %45 : vector<8x32xf32>
    %cst_32 = arith.constant dense<0.000000e+00> : vector<8xf32>
    %47 = vector.multi_reduction <add>, %46, %cst_32 [1] : vector<8x32xf32> to vector<8xf32>
    %48 = vector.shape_cast %47 : vector<8xf32> to vector<8x1xf32>
    %cst_33 = arith.constant 3.200000e+01 : f32
    %49 = vector.broadcast %cst_33 : f32 to vector<8x1xf32>
    %50 = arith.divf %48, %49 : vector<8x1xf32>
    %cst_34 = arith.constant 9.99999974E-6 : f32
    %51 = vector.broadcast %cst_34 : f32 to vector<8x1xf32>
    %52 = arith.addf %50, %51 : vector<8x1xf32>
    %53 = math.rsqrt %52 : vector<8x1xf32>
    %54 = vector.broadcast %53 : vector<8x1xf32> to vector<8x32xf32>
    %55 = arith.mulf %45, %54 : vector<8x32xf32>
    %c0_35 = arith.constant 0 : index
    %c0_36 = arith.constant 0 : index
    %56 = vector.load %arg10[%c0_35, %c0_36] : memref<1x32xf32, #tpu.memory_space<vmem>>, vector<1x32xf32>
    %57 = vector.broadcast %56 : vector<1x32xf32> to vector<8x32xf32>
    %58 = arith.mulf %55, %57 : vector<8x32xf32>
    %c0_37 = arith.constant 0 : index
    %c0_38 = arith.constant 0 : index
    %59 = vector.load %arg11[%c0_37, %c0_38] : memref<1x32xf32, #tpu.memory_space<vmem>>, vector<1x32xf32>
    %60 = vector.broadcast %59 : vector<1x32xf32> to vector<8x32xf32>
    %61 = arith.addf %58, %60 : vector<8x32xf32>
    %cst_39 = arith.constant 0.000000e+00 : f32
    %62 = vector.broadcast %cst_39 : f32 to vector<8x32xf32>
    %63 = arith.maximumf %61, %62 : vector<8x32xf32>
    %c0_40 = arith.constant 0 : index
    %c0_41 = arith.constant 0 : index
    %64 = vector.load %arg12[%c0_40, %c0_41] : memref<32x32xf32, #tpu.memory_space<vmem>>, vector<32x32xf32>
    %cst_42 = arith.constant dense<0.000000e+00> : vector<8x32xf32>
    %65 = tpu.matmul %63, %64, %cst_42 {dimension_numbers = #tpu.dot_dimension_numbers<[1], [0], [0], [1], [0, 0, 1, 1], [], []>} : vector<8x32xf32>, vector<32x32xf32>, vector<8x32xf32> -> vector<8x32xf32>
    %c0_43 = arith.constant 0 : index
    %c0_44 = arith.constant 0 : index
    %66 = vector.load %arg13[%c0_43, %c0_44] : memref<1x32xf32, #tpu.memory_space<vmem>>, vector<1x32xf32>
    %67 = vector.broadcast %66 : vector<1x32xf32> to vector<8x32xf32>
    %68 = arith.addf %65, %67 : vector<8x32xf32>
    %69 = arith.subf %68, %6 : vector<8x32xf32>
    %70 = vector.broadcast %31 : vector<8x1xf32> to vector<8x32xf32>
    %71 = arith.mulf %70, %69 : vector<8x32xf32>
    %72 = arith.addf %6, %71 : vector<8x32xf32>
    %c0_45 = arith.constant 0 : index
    %c0_46 = arith.constant 0 : index
    %73 = vector.load %arg17[%c0_45, %c0_46] : memref<8x32xf32, #tpu.memory_space<vmem>>, vector<8x32xf32>
    tpu.vector_store %arg17[%c0_45, %c0_46], %72 {strides = array<i32>} : memref<8x32xf32, #tpu.memory_space<vmem>>, vector<8x32xf32>,
    %74 = vector.shape_cast %31 : vector<8x1xf32> to vector<8x1xf32>
    %75 = vector.broadcast %74 : vector<8x1xf32> to vector<8x128xf32>
    %c0_47 = arith.constant 0 : index
    %c0_48 = arith.constant 0 : index
    %76 = vector.load %arg18[%c0_47, %c0_48] : memref<8x128xf32, #tpu.memory_space<vmem>>, vector<8x128xf32>
    tpu.vector_store %arg18[%c0_47, %c0_48], %75 {strides = array<i32>} : memref<8x128xf32, #tpu.memory_space<vmem>>, vector<8x128xf32>,
    return
  }
  func.func @transform_0(%arg0: i32) -> (i32, i32) {
    %c0_i32 = arith.constant 0 : i32
    %c0_i32_0 = arith.constant 0 : i32
    return %arg0, %c0_i32 : i32, i32
  }
  func.func @transform_1(%arg0: i32) -> (i32, i32) {
    %c0_i32 = arith.constant 0 : i32
    %c0_i32_0 = arith.constant 0 : i32
    return %arg0, %c0_i32 : i32, i32
  }
  func.func @transform_2(%arg0: i32) -> (i32, i32) {
    %c0_i32 = arith.constant 0 : i32
    %c0_i32_0 = arith.constant 0 : i32
    %c0_i32_1 = arith.constant 0 : i32
    return %c0_i32, %c0_i32_0 : i32, i32
  }
  func.func @transform_3(%arg0: i32) -> (i32, i32) {
    %c0_i32 = arith.constant 0 : i32
    %c0_i32_0 = arith.constant 0 : i32
    %c0_i32_1 = arith.constant 0 : i32
    return %c0_i32, %c0_i32_0 : i32, i32
  }
  func.func @transform_4(%arg0: i32) -> (i32, i32) {
    %c0_i32 = arith.constant 0 : i32
    %c0_i32_0 = arith.constant 0 : i32
    %c0_i32_1 = arith.constant 0 : i32
    return %c0_i32, %c0_i32_0 : i32, i32
  }
  func.func @transform_5(%arg0: i32) -> (i32, i32) {
    %c0_i32 = arith.constant 0 : i32
    %c0_i32_0 = arith.constant 0 : i32
    %c0_i32_1 = arith.constant 0 : i32
    return %c0_i32, %c0_i32_0 : i32, i32
  }
  func.func @transform_6(%arg0: i32) -> (i32, i32) {
    %c0_i32 = arith.constant 0 : i32
    %c0_i32_0 = arith.constant 0 : i32
    %c0_i32_1 = arith.constant 0 : i32
    return %c0_i32, %c0_i32_0 : i32, i32
  }
  func.func @transform_7(%arg0: i32) -> (i32, i32) {
    %c0_i32 = arith.constant 0 : i32
    %c0_i32_0 = arith.constant 0 : i32
    %c0_i32_1 = arith.constant 0 : i32
    return %c0_i32, %c0_i32_0 : i32, i32
  }
  func.func @transform_8(%arg0: i32) -> (i32, i32) {
    %c0_i32 = arith.constant 0 : i32
    %c0_i32_0 = arith.constant 0 : i32
    %c0_i32_1 = arith.constant 0 : i32
    return %c0_i32, %c0_i32_0 : i32, i32
  }
  func.func @transform_9(%arg0: i32) -> (i32, i32) {
    %c0_i32 = arith.constant 0 : i32
    %c0_i32_0 = arith.constant 0 : i32
    %c0_i32_1 = arith.constant 0 : i32
    return %c0_i32, %c0_i32_0 : i32, i32
  }
  func.func @transform_10(%arg0: i32) -> (i32, i32) {
    %c0_i32 = arith.constant 0 : i32
    %c0_i32_0 = arith.constant 0 : i32
    %c0_i32_1 = arith.constant 0 : i32
    return %c0_i32, %c0_i32_0 : i32, i32
  }
  func.func @transform_11(%arg0: i32) -> (i32, i32) {
    %c0_i32 = arith.constant 0 : i32
    %c0_i32_0 = arith.constant 0 : i32
    %c0_i32_1 = arith.constant 0 : i32
    return %c0_i32, %c0_i32_0 : i32, i32
  }
  func.func @transform_12(%arg0: i32) -> (i32, i32) {
    %c0_i32 = arith.constant 0 : i32
    %c0_i32_0 = arith.constant 0 : i32
    %c0_i32_1 = arith.constant 0 : i32
    return %c0_i32, %c0_i32_0 : i32, i32
  }
  func.func @transform_13(%arg0: i32) -> (i32, i32) {
    %c0_i32 = arith.constant 0 : i32
    %c0_i32_0 = arith.constant 0 : i32
    %c0_i32_1 = arith.constant 0 : i32
    return %c0_i32, %c0_i32_0 : i32, i32
  }
  func.func @transform_14(%arg0: i32) -> (i32, i32) {
    %c0_i32 = arith.constant 0 : i32
    %c0_i32_0 = arith.constant 0 : i32
    %c0_i32_1 = arith.constant 0 : i32
    return %c0_i32, %c0_i32_0 : i32, i32
  }
  func.func @transform_15(%arg0: i32) -> (i32, i32) {
    %c0_i32 = arith.constant 0 : i32
    %c0_i32_0 = arith.constant 0 : i32
    %c0_i32_1 = arith.constant 0 : i32
    return %c0_i32, %c0_i32_0 : i32, i32
  }
  func.func @transform_16(%arg0: i32) -> (i32, i32) {
    %c0_i32 = arith.constant 0 : i32
    %c0_i32_0 = arith.constant 0 : i32
    return %arg0, %c0_i32 : i32, i32
  }
  func.func @transform_17(%arg0: i32) -> (i32, i32) {
    %c0_i32 = arith.constant 0 : i32
    %c0_i32_0 = arith.constant 0 : i32
    return %arg0, %c0_i32 : i32, i32
  }
}

</mosaic_0001>

<bundles_post_ra>
// kernel: tpu_custom_call.1
= control target key start
LH: loop header
LB: loop body
LE: loop exit
PB: predicated region body
PF: predicated region fallthrough
CT: control target
= control target key end

     0   :  { %s898_s0 = inlined_call_operand.hbm [shape: f32[8,32], index: 0, kind: input, shape index: {}]   ;;  %s899_s1 = inlined_call_operand.hbm [shape: f32[8,32], index: 1, kind: input, shape index: {}]   ;;  %s900_s2 = inlined_call_operand.hbm [shape: f32[32,32], index: 2, kind: input, shape index: {}]   ;;  %s901_s3 = inlined_call_operand.vmem [shape: f32[1,32], index: 3, kind: input, shape index: {}]   ;;  %s902_s4 = inlined_call_operand.hbm [shape: f32[32,32], index: 4, kind: input, shape index: {}]   ;;  %s903_s5 = inlined_call_operand.vmem [shape: f32[1,32], index: 5, kind: input, shape index: {}]   ;;  %s904_s6 = inlined_call_operand.hbm [shape: f32[32,32], index: 6, kind: input, shape index: {}]   ;;  %s905_s7 = inlined_call_operand.hbm [shape: f32[32,32], index: 7, kind: input, shape index: {}]   ;;  %s906_s8 = inlined_call_operand.vmem [shape: f32[1,32], index: 8, kind: input, shape index: {}]   ;;  %s907_s9 = inlined_call_operand.vmem [shape: f32[1,32], index: 9, kind: input, shape index: {}]   ;;  %s908_s10 = inlined_call_operand.vmem [shape: f32[1,32], index: 10, kind: input, shape index: {}]   ;;  %s909_s11 = inlined_call_operand.hbm [shape: f32[32,32], index: 11, kind: input, shape index: {}]   ;;  %s910_s12 = inlined_call_operand.vmem [shape: f32[1,32], index: 12, kind: input, shape index: {}]   ;;  %s911_s13 = inlined_call_operand.vmem [shape: f32[1,32], index: 13, kind: input, shape index: {}]   ;;  %s912_s14 = inlined_call_operand.vmem [shape: f32[1,32], index: 14, kind: input, shape index: {}]   ;;  %s913_s15 = inlined_call_operand.<no memory space> [shape: f32[1,1], index: 15, kind: input, shape index: {}]   ;;  %s914_s16 = inlined_call_operand.hbm [shape: f32[8,32], index: 16, kind: output, shape index: {0}]   ;;  %s915_s17 = inlined_call_operand.hbm [shape: f32[8,128], index: 17, kind: output, shape index: {1}]  }
   0x1   :  { %916 = sst [smem:[#allocation24_spill]] %s898_s0  ;;  %v23_v0 = vstv %s913_s15 }
   0x2   :  { %917 = sst [smem:[#allocation25_spill]] %s899_s1  ;;  %24 = vst [vmem:[#allocation2] sm:$0x1] %v23_v0 }
   0x3   :  { %25 = vsyncpa [#allocation4], 0 }
   0x4   :  { %26 = vsyncpa [#allocation7], 0 }
   0x5   :  { %27 = vsyncpa [#allocation10], 0 }
   0x6   :  { %28 = vsyncpa [#allocation13], 0 }
   0x7   :  { %29 = vsyncpa [#allocation5], 0  ;;  %s918_s28 = sld [smem:[#allocation25_spill]] }
   0xd   :  { %s47_s29 = sshll.u32 %s918_s28, 4  ;;  %s48_s29 = int_to_ptr.hbm [resolvable:$true] %s47_s29 }
   0xe   :  { %30 = vsyncpa [#allocation17], 0  ;;  %s710_s0 = smov [#allocation6]   ;;  %s72_s15 = sshll.u32 %s902_s4, 4  ;;  %s73_s15 = int_to_ptr.hbm [resolvable:$true] %s72_s15 }
   0xf   :  { %s49_s30 = sshll.u32 %s710_s0, 4  ;;  %s711_s1 = smov [#allocation9]   ;;  %s50_s30 = int_to_ptr.vmem [resolvable:$true] %s49_s30 }
  0x10   :  { %52 = dma.hbm_to_vmem [thread:$0]  %s48_s29, 128, %s50_s30, [#allocation7]  }
  0x11   :  { %s74_s20 = sshll.u32 %s711_s1, 4  ;;  %s100_s23 = sshll.u32 %s905_s7, 4  ;;  %s75_s20 = int_to_ptr.vmem [resolvable:$true] %s74_s20  ;;  %s101_s23 = int_to_ptr.hbm [resolvable:$true] %s100_s23 }
  0x12   :  { %s712_s24 = smov 128   ;;  %s713_s25 = smov 8  }
  0x13   :  { %80 = dma.hbm_to_vmem [thread:$0]  %s73_s15, 512, %s75_s20, [#allocation10], %s712_s24, %s712_s24, %s713_s25  }
  0x14   :  { %s919_s28 = sld [smem:[#allocation24_spill]]  ;;  %s714_s4 = smov [#allocation12]  }
  0x15   :  { %s102_s0 = sshll.u32 %s714_s4, 4  ;;  %s715_s7 = smov [#allocation3]   ;;  %s103_s0 = int_to_ptr.vmem [resolvable:$true] %s102_s0 }
  0x16   :  { %108 = dma.hbm_to_vmem [thread:$0]  %s101_s23, 512, %s103_s0, [#allocation13], %s712_s24, %s712_s24, %s713_s25  }
  0x17   :  { %s38_s30 = sshll.u32 %s715_s7, 4  ;;  %s57_s1 = sshll.u32 %s900_s2, 4  ;;  %s39_s30 = int_to_ptr.vmem [resolvable:$true] %s38_s30  ;;  %s58_s1 = int_to_ptr.hbm [resolvable:$true] %s57_s1 }
  0x18   :  { %s87_s21 = sshll.u32 %s904_s6, 4  ;;  %s716_s22 = smov [#allocation8]   ;;  %s88_s21 = int_to_ptr.hbm [resolvable:$true] %s87_s21 }
  0x19   :  { %s59_s26 = sshll.u32 %s716_s22, 4  ;;  %s717_s23 = smov [#allocation11]   ;;  %s60_s26 = int_to_ptr.vmem [resolvable:$true] %s59_s26 }
  0x1a   :  { %s36_s29 = sshll.u32 %s919_s28, 4  ;;  %s89_s27 = sshll.u32 %s717_s23, 4  ;;  %s37_s29 = int_to_ptr.hbm [resolvable:$true] %s36_s29  ;;  %s90_s27 = int_to_ptr.vmem [resolvable:$true] %s89_s27 }
  0x1b   :  { %41 = dma.hbm_to_vmem [thread:$0]  %s37_s29, 128, %s39_s30, [#allocation4]  }
  0x1c   :  { %65 = dma.hbm_to_vmem [thread:$0]  %s58_s1, 512, %s60_s26, [#allocation7], %s712_s24, %s712_s24, %s713_s25  }
  0x1d   :  { %s119_s2 = sshll.u32 %s909_s11, 4  ;;  %s718_s6 = smov [#allocation14]   ;;  %s120_s2 = int_to_ptr.hbm [resolvable:$true] %s119_s2 }
  0x1e   :  { %95 = dma.hbm_to_vmem [thread:$0]  %s88_s21, 512, %s90_s27, [#allocation10], %s712_s24, %s712_s24, %s713_s25  }
  0x1f   :  { %s121_s29 = sshll.u32 %s718_s6, 4  ;;  %s122_s29 = int_to_ptr.vmem [resolvable:$true] %s121_s29 }
  0x20   :  { %127 = dma.hbm_to_vmem [thread:$0]  %s120_s2, 512, %s122_s29, [#allocation13], %s712_s24, %s712_s24, %s713_s25  }
  0x21   :  { %698 = dma.done.wait [#allocation4], 128  }
  0x22   :  { %699 = vsyncadd [#allocation4], 4294967168 }
  0x23   :  { %700 = dma.done.wait [#allocation7], 640  }
  0x24   :  { %701 = vsyncadd [#allocation7], 4294966656 }
  0x25   :  { %702 = dma.done.wait [#allocation10], 1024  }
  0x26   :  { %703 = vsyncadd [#allocation10], 4294966272 }
  0x27   :  { %704 = dma.done.wait [#allocation13], 1024  }
  0x28   :  { %705 = vsyncadd [#allocation13], 4294966272  ;;  %v169_v1 = vld [vmem:[#allocation8 + $0x18] sm:$0xff]  ;;  %v168_v3 = vld [vmem:[#allocation8 + $0x10] sm:$0xff]  ;;  %vm174_vm0 = vcmask 261120   ;;  %v719_v31 = vmov 0  }
  0x29   :  { %v209_v2 = vld [vmem:[#allocation9 + $0x18] sm:$0xff]  ;;  %190 = vmatpush.msra.mxu0 %v169_v1  ;;  %v208_v4 = vld [vmem:[#allocation9 + $0x10] sm:$0xff]  ;;  %v167_v5 = vld [vmem:[#allocation8 + $0x8] sm:$0xff]  ;;  %463 = vset.pattern.permute.xlu2 %v719_v31  ;;  %v720_v57 = vmov 32.0   ;;  %s721_s15 = smov [#allocation16]   ;;  %s427_s26 = sshll.u32 %s915_s17, 4  ;;  %s428_s26 = int_to_ptr.hbm [resolvable:$true] %s427_s26 }
  0x2a   :  { %229 = vmatpush.msra.mxu1 %v209_v2  ;;  %v207_v6 = vld [vmem:[#allocation9 + $0x8] sm:$0xff]  ;;  %v166_v7 = vld [vmem:[#allocation8] sm:$0xff]  ;;  %v164_v9 = vld [vmem:[#allocation3] sm:$0xff]  ;;  %464 = vset.pattern.permute.xlu0 %v719_v31  ;;  %s425_s20 = sshll.u32 %s721_s15, 4  ;;  %s416_s2 = sshll.u32 %s914_s16, 4  ;;  %s426_s20 = int_to_ptr.vmem [resolvable:$true] %s425_s20  ;;  %s417_s2 = int_to_ptr.hbm [resolvable:$true] %s416_s2 }
  0x2b   :  { %v206_v8 = vld [vmem:[#allocation9] sm:$0xff]  ;;  %191 = vmatpush.msra.mxu0 %v168_v3  ;;  %v276_v10 = vld [vmem:[#allocation12 + $0x18] sm:$0xff]  ;;  %v275_v12 = vld [vmem:[#allocation12 + $0x10] sm:$0xff] }
  0x2c   :  { %230 = vmatpush.msra.mxu1 %v208_v4  ;;  %v272_v11 = vld [vmem:[#allocation11 + $0x18] sm:$0xff]  ;;  %292 = vmatpush.msra.mxu2 %v276_v10  ;;  %v271_v13 = vld [vmem:[#allocation11 + $0x10] sm:$0xff]  ;;  %v274_v15 = vld [vmem:[#allocation12 + $0x8] sm:$0xff] }
  0x2d   :  { %315 = vmatpush.msra.mxu3 %v272_v11  ;;  %192 = vmatpush.msra.mxu0 %v167_v5  ;;  %v165_v14 = vld [vmem:[#allocation6] sm:$0xff]  ;;  %v270_v16 = vld [vmem:[#allocation11 + $0x8] sm:$0xff]  ;;  %v273_v17 = vld [vmem:[#allocation12] sm:$0xff] }
  0x2e   :  { %231 = vmatpush.msra.mxu1 %v207_v6  ;;  %293 = vmatpush.msra.mxu2 %v275_v12  ;;  %v269_v18 = vld [vmem:[#allocation11] sm:$0xff]  ;;  %v465_v19 = vld [vmem:[%s901_s3] ss:$0 sm:$0xff]  ;;  %v371_v6 = vld [vmem:[#allocation14 + $0x18] sm:$0xff] }
  0x2f   :  { %316 = vmatpush.msra.mxu3 %v271_v13  ;;  %193 = vmatpush.msra.mxu0 %v166_v7  ;;  %v466_v20 = vld [vmem:[%s903_s5] ss:$0 sm:$0xff]  ;;  %v370_v7 = vld [vmem:[#allocation14 + $0x10] sm:$0xff] }
  0x30   :  { %232 = vmatpush.msra.mxu1 %v206_v8  ;;  %445 = vmatmul.msk.f32.vlgmr.msra.gmra.mxu0 %vm174_vm0, %v164_v9  ;;  %v467_v21 = vld [vmem:[%s911_s13] ss:$0 sm:$0xff]  ;;  %v368_v9 = vld [vmem:[#allocation14] sm:$0xff] }
  0x31   :  { %446 = vmatmul.msk.f32.vlgmr.msra.gmra.mxu1 %vm174_vm0, %v165_v14  ;;  %294 = vmatpush.msra.mxu2 %v274_v15  ;;  %v468_v28 = vld [vmem:[%s912_s14] ss:$0 sm:$0xff] }
  0x32   :  { %317 = vmatpush.msra.mxu3 %v270_v16  ;;  %v469_v33 = vld [vmem:[#allocation2] ss:$0 sm:$0xff]  ;;  %391 = vmatpush.msrb.mxu0 %v371_v6 }
  0x33   :  { %295 = vmatpush.msra.mxu2 %v273_v17  ;;  %v470_v37 = vld [vmem:[%s906_s8] ss:$0 sm:$0xff] }
  0x34   :  { %318 = vmatpush.msra.mxu3 %v269_v18  ;;  %v369_v8 = vld [vmem:[#allocation14 + $0x8] sm:$0xff]  ;;  %392 = vmatpush.msrb.mxu0 %v370_v7 }
  0x36   :  { %393 = vmatpush.msrb.mxu0 %v369_v8 }
  0x38   :  { %394 = vmatpush.msrb.mxu0 %v368_v9 }
  0xad   :  { %v195_v22 = vpop.f32.mrf.mxu0 }
  0xae   :  { %v234_v23 = vpop.f32.mrf.mxu1  ;;  %v863_v24 = vadd.f32 %v465_v19, %v195_v22  ;;  %v471_v19 = vld [vmem:[%s907_s9] ss:$0 sm:$0xff] }
  0xaf   :  { %v235_v25 = vadd.f32 %v466_v20, %v234_v23  ;;  %v472_v22 = vld [vmem:[%s908_s10] ss:$0 sm:$0xff]  ;;  %s722_s10 = smov [#allocation15]  }
  0xb0   :  { %448 = vmatmul.msk.f32.vlgmr.msra.gmra.mxu3 %vm174_vm0, %v863_v24  ;;  %v202_v26 = vmul.f32 %v467_v21, %v863_v24  ;;  %s414_s27 = sshll.u32 %s722_s10, 4  ;;  %s415_s27 = int_to_ptr.vmem [resolvable:$true] %s414_s27 }
  0xb1   :  { %447 = vmatmul.msk.f32.vlgmr.msra.gmra.mxu2 %vm174_vm0, %v235_v25  ;;  %v241_v29 = vmul.f32 %v468_v28, %v235_v25 }
  0xb2   :  { %v203_v27 = vsel %vm174_vm0, %v202_v26, 0.0 }
  0xb3   :  { %204 = vadd.xlane.f32.xlu1 %v203_v27  ;;  %v242_v30 = vsel %vm174_vm0, %v241_v29, 0.0  ;;  %v473_v27 = vld [vmem:[%s910_s12] ss:$0 sm:$0xff] }
  0xbb   :  { %243 = vadd.xlane.f32.xlu1 %v242_v30 }
 0x126   :  { %v205_v32 = vpop.xlane.xlu1 %204 }
 0x12e   :  { %v244_v34 = vpop.xlane.xlu1 %243 }
 0x12f   :  { %v245_v35 = vadd.f32 %v244_v34, %v205_v32 }
 0x131   :  { %v250_v36 = vadd.f32 %v469_v33, %v245_v35 }
 0x133   :  { %v251_v38 = vsub.f32 0.0, %v250_v36  ;;  %v320_v40 = vpop.f32.mrf.mxu3 }
 0x134   :  { %v297_v39 = vpop.f32.mrf.mxu2 }
 0x135   :  { %v321_v41 = vadd.f32 %v320_v40, %v297_v39  ;;  %v252_v42 = vmul.f32 1.442695, %v251_v38 }
 0x137   :  { %v327_v43 = vadd.f32 %v470_v37, %v321_v41  ;;  %474 = vpow2.f32 %v252_v42 }
 0x139   :  { %v328_v44 = vsel %vm174_vm0, %v327_v43, 0.0 }
 0x13a   :  { %329 = vadd.xlane.f32.xlu0 %v328_v44 }
 0x13d   :  { %v475_v45 = vpop.eup %474 }
 0x13e   :  { %v254_v46 = vadd.f32 1.0, %v475_v45 }
 0x140   :  { %476 = vrcp.f32 %v254_v46  ;;  %v266_v50 = vand.u32 2147483648, %v254_v46  ;;  %v264_v52 = vand.u32 2147483647, %v254_v46  ;;  %vm260_vm2 = vweird.f32 %v254_v46 }
 0x141   :  { %478 = vrcp.f32 %v720_v57 }
 0x142   :  { %v267_v54 = vor.u32 1.1754944e-38, %v266_v50  ;;  %vm265_vm4 = vcmp.eq.f32.partialorder %v264_v52, 8.507059e+37 }
 0x146   :  { %v477_v47 = vpop.eup %476 }
 0x147   :  { %v256_v48 = vmul.f32 %v477_v47, %v254_v46  ;;  %vm261_vm1 = vweird.f32 %v477_v47  ;;  %v479_v58 = vpop.eup %478 }
 0x148   :  { %vm262_vm3 = vmor %vm260_vm2, %vm261_vm1  ;;  %v332_v59 = vmul.f32 32.0, %v479_v58  ;;  %vm336_vm5 = vweird.f32 %v479_v58 }
 0x149   :  { %v257_v49 = vsub.f32 1.0, %v256_v48 }
 0x14a   :  { %v333_v60 = vsub.f32 1.0, %v332_v59 }
 0x14b   :  { %v258_v51 = vmul.f32 %v477_v47, %v257_v49 }
 0x14c   :  { %v334_v61 = vmul.f32 %v479_v58, %v333_v60 }
 0x14d   :  { %v259_v53 = vadd.f32 %v477_v47, %v258_v51 }
 0x14e   :  { %v335_v62 = vadd.f32 %v479_v58, %v334_v61 }
 0x14f   :  { %v263_v55 = vsel %vm262_vm3, %v477_v47, %v259_v53 }
 0x150   :  { %v268_v56 = vsel %vm265_vm4, %v267_v54, %v263_v55  ;;  %v337_v63 = vsel %vm336_vm5, %v479_v58, %v335_v62 }
 0x151   :  { %402 = vperm.xlu2 %463, %v268_v56  }
 0x1ab   :  { %v403_v0 = vpop.permute.xlu2 %402 }
 0x1ac   :  { %408 = vst [vmem:[#allocation16] sm:$0xff] %v403_v0 }
 0x1ad   :  { %v330_v1 = vpop.xlane.xlu0 %329  ;;  %430 = dma.vmem_to_hbm [thread:$0]  %s426_s20, 128, %s428_s26, [#allocation17]  }
 0x1ae   :  { %v338_v2 = vmul.f32 %v337_v63, %v330_v1 }
 0x1b0   :  { %v339_v3 = vsub.f32 %v327_v43, %v338_v2 }
 0x1b2   :  { %v340_v4 = vmul.f32 %v339_v3, %v339_v3 }
 0x1b4   :  { %v341_v5 = vsel %vm174_vm0, %v340_v4, 0.0 }
 0x1b5   :  { %342 = vadd.xlane.f32.xlu0 %v341_v5 }
 0x228   :  { %v343_v10 = vpop.xlane.xlu0 %342 }
 0x229   :  { %v344_v11 = vmul.f32 %v343_v10, %v337_v63 }
 0x22b   :  { %v345_v12 = vadd.f32 1e-05, %v344_v11 }
 0x22d   :  { %480 = vrsqrt.f32 %v345_v12  ;;  %vm352_vm7 = vweird.f32 %v345_v12 }
 0x233   :  { %v481_v13 = vpop.eup %480 }
 0x234   :  { %v347_v14 = vmul.f32 %v481_v13, %v345_v12  ;;  %vm353_vm6 = vweird.f32 %v481_v13 }
 0x235   :  { %vm354_vm8 = vmor %vm352_vm7, %vm353_vm6 }
 0x236   :  { %v348_v15 = vmul.f32 %v481_v13, %v347_v14 }
 0x238   :  { %v349_v16 = vmul.f32 0.5, %v348_v15 }
 0x23a   :  { %v350_v17 = vsub.f32 1.5, %v349_v16 }
 0x23c   :  { %v351_v18 = vmul.f32 %v481_v13, %v350_v17 }
 0x23e   :  { %v355_v20 = vsel %vm354_vm8, %v481_v13, %v351_v18 }
 0x23f   :  { %v356_v21 = vmul.f32 %v355_v20, %v339_v3 }
 0x241   :  { %v361_v23 = vmul.f32 %v471_v19, %v356_v21 }
 0x243   :  { %v366_v25 = vadd.f32 %v472_v22, %v361_v23 }
 0x245   :  { %v367_v26 = vmax.f32 %v366_v25, 0.0 }
 0x247   :  { %449 = vmatmul.msk.f32.vlgmr.msrb.gmra.mxu0 %vm174_vm0, %v367_v26 }
 0x2c4   :  { %v396_v28 = vpop.f32.mrf.mxu0 }
 0x2c5   :  { %v397_v29 = vadd.f32 %v473_v27, %v396_v28 }
 0x2c7   :  { %v399_v30 = vsub.f32 %v397_v29, %v863_v24 }
 0x2c9   :  { %v405_v31 = vmul.f32 %v403_v0, %v399_v30 }
 0x2cb   :  { %v406_v32 = vadd.f32 %v405_v31, %v863_v24 }
 0x2cd   :  { %407 = vst.msk [vmem:[#allocation15] sm:$0xff] %vm174_vm0, %v406_v32 }
 0x2ce   :  { %419 = dma.vmem_to_hbm [thread:$0]  %s415_s27, 128, %s417_s2, [#allocation5]  }
 0x2cf   :  { %706 = dma.done.wait [#allocation5], 128  }
 0x2d0   :  { %707 = vsyncadd [#allocation5], 4294967168 }
 0x2d1   :  { %708 = dma.done.wait [#allocation17], 128  }
 0x2d2   :  { %709 = vsyncadd [#allocation17], 4294967168 }
 0x2d3   :  { %439 = vsyncpa [#allocation4], 1 }
 0x2d4   :  { %440 = vsyncpa [#allocation7], 1 }
 0x2d5   :  { %441 = vsyncpa [#allocation10], 1 }
 0x2d6   :  { %442 = vsyncpa [#allocation13], 1 }
 0x2d7   :  { %443 = vsyncpa [#allocation5], 1 }
 0x2d8   :  { %444 = vsyncpa [#allocation17], 1 }

</bundles_post_ra>
